<compile_context>
chip_gen: v7x
topology: tpu7x:2x2x1
jax: 0.10.0
libtpu: 0.0.40
codegen_flags: <defaults>
</compile_context>

<pallas_src>
import jax
import jax.numpy as jnp
from jax.experimental import pallas as pl
from jax.experimental.pallas import tpu as pltpu


def _round_up(x, m):
    return ((x + m - 1) // m) * m


def attn_net_gated(x, wa, ba, wb, bb, wc, bc, *, tile_n=512):
    """x: (N, L); wa/wb: (L, D); ba/bb: (1, D); wc: (D, C); bc: (1, C).

    Returns (A, x) with A: (N, C) float32 — matches Attn_Net_Gated.forward.
    """
    N, L = x.shape
    D = wa.shape[1]
    C = wc.shape[1]

    # ---- fuse the a/b branches into one (L, 2D) matmul operand (bf16) -----
    w_ab = jnp.concatenate([wa, wb], axis=1).astype(jnp.bfloat16)   # (L, 2D)
    b_ab = jnp.concatenate([ba, bb], axis=1).astype(jnp.float32)    # (1, 2D)

    # C == 1 (module default): do the final projection on the VPU/XLU as a
    # broadcast-multiply + lane reduce instead of a nearly-empty MXU matmul.
    use_vpu_proj = (C == 1)
    if use_vpu_proj:
        wc_arg = wc.astype(jnp.float32).T            # (1, D)
    else:
        wc_arg = wc.astype(jnp.bfloat16)             # (D, C)
    bc_arg = bc.astype(jnp.float32)                  # (1, C)

    # ---- tile over N; pad N up to a multiple of the tile ------------------
    tn = min(tile_n, _round_up(N, 8))                # tile rows (multiple of 8)
    n_pad = _round_up(N, tn)
    x_in = x if n_pad == N else jnp.pad(x, ((0, n_pad - N), (0, 0)))
    grid = (n_pad // tn,)

    def kernel(x_ref, wab_ref, bab_ref, wc_ref, bc_ref, out_ref):
        # bf16 operands on the MXU, f32 accumulation.
        # (Optionally store x in HBM as bf16 upstream to also halve HBM bytes.)
        xt = x_ref[...].astype(jnp.bfloat16)                           # (tn, L)
        ab = jnp.dot(xt, wab_ref[...],
                     preferred_element_type=jnp.float32) + bab_ref[...]  # (tn, 2D)
        a = jnp.tanh(ab[:, :D])                                        # (tn, D)
        b = jax.nn.sigmoid(ab[:, D:])                                  # (tn, D)
        gated = a * b                                                  # (tn, D) f32
        if use_vpu_proj:
            # (tn, D) * (1, D) -> lane reduce -> (tn, 1); MXU stays free.
            A = jnp.sum(gated * wc_ref[...], axis=-1, keepdims=True)
        else:
            A = jnp.dot(gated.astype(jnp.bfloat16), wc_ref[...],
                        preferred_element_type=jnp.float32)            # (tn, C)
        out_ref[...] = (A + bc_ref[...]).astype(out_ref.dtype)

    def const_spec(shape):
        # Weight/bias blocks: same block every grid step -> stays VMEM-resident.
        return pl.BlockSpec(shape, lambda i: (0,) * len(shape))

    A = pl.pallas_call(
        kernel,
        out_shape=jax.ShapeDtypeStruct((n_pad, C), jnp.float32),
        grid=grid,
        in_specs=[
            pl.BlockSpec((tn, L), lambda i: (i, 0)),   # x tiles, pipelined over N
            const_spec(w_ab.shape),                    # fused branch weights
            const_spec(b_ab.shape),                    # fused branch biases
            const_spec(wc_arg.shape),                  # projection weights
            const_spec(bc_arg.shape),                  # projection bias
        ],
        out_specs=pl.BlockSpec((tn, C), lambda i: (i, 0)),
        compiler_params=pltpu.CompilerParams(
            dimension_semantics=("parallel",),         # shards N across v7x's 2 TCs
            vmem_limit_bytes=32 * 1024 * 1024,         # safe on v5e/v6e/v7x for tn<=512
        ),
    )(x_in, w_ab, b_ab, wc_arg, bc_arg)

    if n_pad != N:
        A = A[:N]
    # Module returns (A, x): attention logits plus the untouched input.
    return A, x


def init_params(key, L, D, n_classes):
    """Deterministic nn.Linear-style init."""
    k = jax.random.split(key, 6)

    def linear(kw, kb, fan_in, fan_out):
        bound = 1.0 / jnp.sqrt(fan_in)
        w = jax.random.uniform(kw, (fan_in, fan_out), jnp.float32, -bound, bound)
        b = jax.random.uniform(kb, (1, fan_out), jnp.float32, -bound, bound)
        return w, b

    wa, ba = linear(k[0], k[1], L, D)
    wb, bb = linear(k[2], k[3], L, D)
    wc, bc = linear(k[4], k[5], D, n_classes)
    return wa, ba, wb, bb, wc, bc


def _reference(x, wa, ba, wb, bb, wc, bc):
    a = jnp.tanh(x @ wa + ba)
    b = jax.nn.sigmoid(x @ wb + bb)
    return (a * b) @ wc + bc


if __name__ == "__main__":
    key = jax.random.PRNGKey(0)

    # Case 1: module defaults scaled down (n_classes=1, N not a multiple of 8
    # to exercise the padding path).
    N, L, D, C = 10, 32, 16, 1
    kx, kp, k2 = jax.random.split(key, 3)
    x = jax.random.normal(kx, (N, L), dtype=jnp.float32)
    params = init_params(kp, L, D, C)

    A, x_out = attn_net_gated(x, *params)
    jax.block_until_ready(A)
    jax.block_until_ready(x_out)

    A_ref = _reference(x, *params)
    assert A.shape == (N, C)
    assert x_out.shape == (N, L)
    # bf16 MXU operands with f32 accumulation -> loose tolerance vs f32 ref.
    assert jnp.allclose(A, A_ref, atol=2e-2, rtol=2e-2), float(jnp.max(jnp.abs(A - A_ref)))
    assert jnp.array_equal(x_out, x)

    # Case 2: n_classes > 1 exercises the MXU projection path.
    N2, C2 = 16, 3
    kx2, kp2 = jax.random.split(k2)
    x2 = jax.random.normal(kx2, (N2, L), dtype=jnp.float32)
    params2 = init_params(kp2, L, D, C2)

    A2, x2_out = attn_net_gated(x2, *params2)
    jax.block_until_ready(A2)
    A2_ref = _reference(x2, *params2)
    assert A2.shape == (N2, C2)
    assert jnp.allclose(A2, A2_ref, atol=2e-2, rtol=2e-2), float(jnp.max(jnp.abs(A2 - A2_ref)))
    assert jnp.array_equal(x2_out, x2)

    print("KERNEL_OK")
</pallas_src>

<mosaic_0001>
module attributes {stable_mosaic.version = 11 : i64} {
  func.func @kernel(%arg0: i32, %arg1: memref<16x32xf32, #tpu.memory_space<vmem>>, %arg2: memref<32x32xbf16, #tpu.memory_space<vmem>>, %arg3: memref<1x32xf32, #tpu.memory_space<vmem>>, %arg4: memref<1x16xf32, #tpu.memory_space<vmem>>, %arg5: memref<1x1xf32, #tpu.memory_space<vmem>>, %arg6: memref<16x1xf32, #tpu.memory_space<vmem>>) attributes {dimension_semantics = [#tpu.dimension_semantics<parallel>], iteration_bounds = array<i64: 1>, scalar_prefetch = 0 : i64, scratch_operands = 0 : i64, tpu.core_type = #tpu.core_type<tc>, window_params = [{transform_indices = @transform_0, window_bounds = array<i64: 16, 32>}, {pipeline_mode = #tpu.pipeline_mode<synchronous>, transform_indices = @transform_1, window_bounds = array<i64: 32, 32>}, {pipeline_mode = #tpu.pipeline_mode<synchronous>, transform_indices = @transform_2, window_bounds = array<i64: 1, 32>}, {pipeline_mode = #tpu.pipeline_mode<synchronous>, transform_indices = @transform_3, window_bounds = array<i64: 1, 16>}, {pipeline_mode = #tpu.pipeline_mode<synchronous>, transform_indices = @transform_4, window_bounds = array<i64: 1, 1>}, {transform_indices = @transform_5, window_bounds = array<i64: 16, 1>}]} {
    %c0 = arith.constant 0 : index
    %c0_0 = arith.constant 0 : index
    %0 = vector.load %arg1[%c0, %c0_0] : memref<16x32xf32, #tpu.memory_space<vmem>>, vector<16x32xf32>
    %1 = arith.truncf %0 : vector<16x32xf32> to vector<16x32xbf16>
    %c0_1 = arith.constant 0 : index
    %c0_2 = arith.constant 0 : index
    %2 = vector.load %arg2[%c0_1, %c0_2] : memref<32x32xbf16, #tpu.memory_space<vmem>>, vector<32x32xbf16>
    %cst = arith.constant dense<0.000000e+00> : vector<16x32xf32>
    %3 = tpu.matmul %1, %2, %cst {dimension_numbers = #tpu.dot_dimension_numbers<[1], [0], [0], [1], [0, 0, 1, 1], [], []>} : vector<16x32xbf16>, vector<32x32xbf16>, vector<16x32xf32> -> vector<16x32xf32>
    %c0_3 = arith.constant 0 : index
    %c0_4 = arith.constant 0 : index
    %4 = vector.load %arg3[%c0_3, %c0_4] : memref<1x32xf32, #tpu.memory_space<vmem>>, vector<1x32xf32>
    %5 = vector.broadcast %4 : vector<1x32xf32> to vector<16x32xf32>
    %6 = arith.addf %3, %5 : vector<16x32xf32>
    %7 = vector.extract_strided_slice %6 {offsets = [0, 0], sizes = [16, 16], strides = [1, 1]} : vector<16x32xf32> to vector<16x16xf32>
    %8 = math.tanh %7 : vector<16x16xf32>
    %9 = vector.extract_strided_slice %6 {offsets = [0, 16], sizes = [16, 16], strides = [1, 1]} : vector<16x32xf32> to vector<16x16xf32>
    %10 = arith.negf %9 : vector<16x16xf32>
    %11 = math.exp %10 : vector<16x16xf32>
    %cst_5 = arith.constant 1.000000e+00 : f32
    %12 = vector.broadcast %cst_5 : f32 to vector<16x16xf32>
    %13 = arith.addf %12, %11 : vector<16x16xf32>
    %14 = arith.divf %12, %13 : vector<16x16xf32>
    %15 = arith.mulf %8, %14 : vector<16x16xf32>
    %c0_6 = arith.constant 0 : index
    %c0_7 = arith.constant 0 : index
    %16 = vector.load %arg4[%c0_6, %c0_7] : memref<1x16xf32, #tpu.memory_space<vmem>>, vector<1x16xf32>
    %17 = vector.broadcast %16 : vector<1x16xf32> to vector<16x16xf32>
    %18 = arith.mulf %15, %17 : vector<16x16xf32>
    %cst_8 = arith.constant dense<0.000000e+00> : vector<16xf32>
    %19 = vector.multi_reduction <add>, %18, %cst_8 [1] : vector<16x16xf32> to vector<16xf32>
    %20 = vector.shape_cast %19 : vector<16xf32> to vector<16x1xf32>
    %c0_9 = arith.constant 0 : index
    %c0_10 = arith.constant 0 : index
    %21 = vector.load %arg5[%c0_9, %c0_10] : memref<1x1xf32, #tpu.memory_space<vmem>>, vector<1x1xf32>
    %22 = vector.broadcast %21 : vector<1x1xf32> to vector<16x1xf32>
    %23 = arith.addf %20, %22 : vector<16x1xf32>
    %c0_11 = arith.constant 0 : index
    %c0_12 = arith.constant 0 : index
    %24 = vector.load %arg6[%c0_11, %c0_12] : memref<16x1xf32, #tpu.memory_space<vmem>>, vector<16x1xf32>
    tpu.vector_store %arg6[%c0_11, %c0_12], %23 {strides = array<i32>} : memref<16x1xf32, #tpu.memory_space<vmem>>, vector<16x1xf32>,
    return
  }
  func.func @transform_0(%arg0: i32) -> (i32, i32) {
    %c0_i32 = arith.constant 0 : i32
    %c0_i32_0 = arith.constant 0 : i32
    return %arg0, %c0_i32 : i32, i32
  }
  func.func @transform_1(%arg0: i32) -> (i32, i32) {
    %c0_i32 = arith.constant 0 : i32
    %c0_i32_0 = arith.constant 0 : i32
    %c0_i32_1 = arith.constant 0 : i32
    return %c0_i32, %c0_i32_0 : i32, i32
  }
  func.func @transform_2(%arg0: i32) -> (i32, i32) {
    %c0_i32 = arith.constant 0 : i32
    %c0_i32_0 = arith.constant 0 : i32
    %c0_i32_1 = arith.constant 0 : i32
    return %c0_i32, %c0_i32_0 : i32, i32
  }
  func.func @transform_3(%arg0: i32) -> (i32, i32) {
    %c0_i32 = arith.constant 0 : i32
    %c0_i32_0 = arith.constant 0 : i32
    %c0_i32_1 = arith.constant 0 : i32
    return %c0_i32, %c0_i32_0 : i32, i32
  }
  func.func @transform_4(%arg0: i32) -> (i32, i32) {
    %c0_i32 = arith.constant 0 : i32
    %c0_i32_0 = arith.constant 0 : i32
    %c0_i32_1 = arith.constant 0 : i32
    return %c0_i32, %c0_i32_0 : i32, i32
  }
  func.func @transform_5(%arg0: i32) -> (i32, i32) {
    %c0_i32 = arith.constant 0 : i32
    %c0_i32_0 = arith.constant 0 : i32
    return %arg0, %c0_i32 : i32, i32
  }
}

</mosaic_0001>

<bundles_post_ra>
// kernel: tpu_custom_call.1
= control target key start
LH: loop header
LB: loop body
LE: loop exit
PB: predicated region body
PF: predicated region fallthrough
CT: control target
= control target key end

     0   :  { %s348_s0 = inlined_call_operand.hbm [shape: f32[16,32], index: 0, kind: input, shape index: {}]   ;;  %s349_s1 = inlined_call_operand.hbm [shape: bf16[32,32], index: 1, kind: input, shape index: {}]   ;;  %s350_s2 = inlined_call_operand.vmem [shape: f32[1,32], index: 2, kind: input, shape index: {}]   ;;  %s351_s3 = inlined_call_operand.vmem [shape: f32[1,16], index: 3, kind: input, shape index: {}]   ;;  %s352_s4 = inlined_call_operand.<no memory space> [shape: f32[1,1], index: 4, kind: input, shape index: {}]   ;;  %s353_s5 = inlined_call_operand.vmem [shape: f32[16,1], index: 5, kind: output, shape index: {}]  }
   0x1   :  { %v10_v0 = vstv %s352_s4 }
   0x2   :  { %11 = vst [vmem:[#allocation2] sm:$0x1] %v10_v0 }
   0x3   :  { %12 = vsyncpa [#allocation4], 0 }
   0x4   :  { %13 = vsyncpa [#allocation6], 0  ;;  %s270_s20 = smov [#allocation3]   ;;  %s222_s24 = scalar_lea.hbm %s348_s0, 256 }
   0x5   :  { %s19_s21 = sshll.u32 %s270_s20, 4  ;;  %p223_p0 = scmp.ne.s32.totalorder %s348_s0, %s222_s24  ;;  %s20_s21 = int_to_ptr.vmem [resolvable:$true] %s19_s21 }
   0x6   :  { %p226_p1 = scmp.lt.u32.totalorder %s222_s24, %s348_s0 }
   0x8   :  { %p228_p2 = pnand %p226_p1, %p223_p0 }
   0xa   :  { %231 = shalt.err (!%p228_p2)
}
   0xb   :  { %s232_s4 = scalar_lea.vmem %s20_s21, 256  ;;  %p237_p4 = scmp.lt.s32.totalorder %s20_s21, %s20_s21 }
   0xc   :  { %p233_p3 = scmp.ne.s32.totalorder %s20_s21, %s232_s4  ;;  %p238_p5 = scmp.lt.s32.totalorder %s232_s4, %s232_s4 }
   0xe   :  { %p239_p6 = por %p238_p5, %p237_p4 }
  0x10   :  { %p240_p7 = pnand %p239_p6, %p233_p3 }
  0x12   :  { %243 = shalt.err (!%p240_p7)
}
  0x13   :  { %s271_s29 = smov 128   ;;  %s272_s30 = smov 8  }
  0x14   :  { %25 = dma.hbm_to_vmem [thread:$0]  %s348_s0, 256, %s20_s21, [#allocation4], %s271_s29, %s271_s29, %s272_s30  }
  0x15   :  { %s273_s8 = smov [#allocation5]   ;;  %s244_s12 = scalar_lea.hbm %s349_s1, 256 }
  0x16   :  { %s31_s9 = sshll.u32 %s273_s8, 4  ;;  %p245_p8 = scmp.ne.s32.totalorder %s349_s1, %s244_s12  ;;  %s32_s9 = int_to_ptr.vmem [resolvable:$true] %s31_s9 }
  0x17   :  { %p248_p9 = scmp.lt.u32.totalorder %s244_s12, %s349_s1 }
  0x19   :  { %p250_p10 = pnand %p248_p9, %p245_p8 }
  0x1b   :  { %253 = shalt.err (!%p250_p10)
}
  0x1c   :  { %s254_s17 = scalar_lea.vmem %s32_s9, 256  ;;  %p259_p12 = scmp.lt.s32.totalorder %s32_s9, %s32_s9 }
  0x1d   :  { %p255_p11 = scmp.ne.s32.totalorder %s32_s9, %s254_s17  ;;  %p260_p13 = scmp.lt.s32.totalorder %s254_s17, %s254_s17 }
  0x1f   :  { %p261_p0 = por %p260_p13, %p259_p12 }
  0x21   :  { %p262_p1 = pnand %p261_p0, %p255_p11 }
  0x23   :  { %265 = shalt.err (!%p262_p1)
}
  0x24   :  { %s274_s0 = smov 64   ;;  %s275_s18 = smov 4  }
  0x25   :  { %37 = dma.hbm_to_vmem [thread:$0]  %s349_s1, 256, %s32_s9, [#allocation6], %s274_s0, %s274_s0, %s275_s18  }
  0x26   :  { %266 = dma.done.wait [#allocation4], 256  }
  0x27   :  { %267 = vsyncadd [#allocation4], 4294967040 }
  0x28   :  { %268 = dma.done.wait [#allocation6], 256  }
  0x29   :  { %269 = vsyncadd [#allocation6], 4294967040  ;;  %v276_v1 = vmov 0.0   ;;  %vm277_vm0 = vmmov 0   ;;  %v208_v2 = vld [vmem:[#allocation5] sm:$0xff]   ;;  %v209_v3 = vld [vmem:[#allocation5 + $0x8] sm:$0xff]  }
  0x2a   :  { %191 = vmatprep.subr.bf16.mxu0 %v276_v1  ;;  %195 = vmatprep.mubr.msk.bf16.mxu0 %vm277_vm0, %v276_v1  ;;  %v51_v4 = vld [vmem:[#allocation3] sm:$0xff]  ;;  %v52_v5 = vld [vmem:[#allocation3 + $0x8] sm:$0xff]  ;;  %vm77_vm1 = vcmask 261120   ;;  %v180_v7 = vld [vmem:[%s350_s2] ss:$0 sm:$0xff]  ;;  %s278_s22 = smov 112  }
  0x2b   :  { %192 = vmatpush3.bf16.msra.mxu0 %v208_v2  ;;  %v53_v6 = vpack.c.bf16 %v52_v5, %v51_v4  ;;  %v186_v24 = vld [vmem:[%s351_s3] ss:$0 sm:$0xff]  ;;  %vm155_vm2 = vcmask 130048   ;;  %vm171_vm3 = vcmask 7168  }
  0x2c   :  { %193 = vmatprep.subr.bf16.mxu0 %v276_v1  ;;  %v187_v33 = vld [vmem:[#allocation2] ss:$0 sm:$0xff] }
  0x2f   :  { %194 = vmatpush3.bf16.msra.mxu0 %v209_v3 }
  0x32   :  { %196 = vmatmul.mubr.msk.bf16.vlgmr.msra.gmra.mrb[0].mxu0 %vm77_vm1, %v53_v6 }
 0x105   :  { %v115_v8 = vpop.f32.mrb[0].mxu0 }
 0x106   :  { %v116_v9 = vadd.f32 %v180_v7, %v115_v8  ;;  %v197_v10 = vpop.f32.mrb[1].mxu0 }
 0x107   :  { %v118_v11 = vpop.f32.mrb[2].mxu0 }
 0x108   :  { %v184_v12 = vmul.f32 -1.442695, %v116_v9  ;;  %v119_v13 = vadd.f32 %v180_v7, %v118_v11  ;;  %v198_v14 = vpop.f32.mrb[3].mxu0 }
 0x10a   :  { %210 = vpow2.f32 %v184_v12  ;;  %v185_v15 = vmul.f32 -1.442695, %v119_v13 }
 0x10c   :  { %212 = vpow2.f32 %v185_v15 }
 0x114   :  { %v211_v16 = vpop.eup %210 }
 0x115   :  { %v130_v17 = vadd.f32 1.0, %v211_v16 }
 0x116   :  { %v213_v18 = vpop.eup %212 }
 0x117   :  { %214 = vrcp.f32 %v130_v17  ;;  %v131_v19 = vadd.f32 1.0, %v213_v18 }
 0x119   :  { %216 = vrcp.f32 %v131_v19 }
 0x11a   :  { %218 = vtanh.f32 %v116_v9 }
 0x11b   :  { %220 = vtanh.f32 %v119_v13 }
 0x121   :  { %v215_v20 = vpop.eup %214 }
 0x122   :  { %138 = vrot.lane.b32.xlu0 %v215_v20, %s278_s22 }
 0x123   :  { %v217_v21 = vpop.eup %216 }
 0x124   :  { %v219_v22 = vpop.eup %218 }
 0x125   :  { %v221_v27 = vpop.eup %220 }
 0x126   :  { %140 = vrot.lane.b32.xlu0 %v217_v21, %s278_s22 }
 0x194   :  { %v139_v23 = vpop.permute.xlu0 %138 }
 0x195   :  { %v144_v25 = vmul.f32 %v219_v22, %v139_v23 }
 0x197   :  { %v153_v26 = vmul.f32 %v186_v24, %v144_v25 }
 0x198   :  { %v141_v28 = vpop.permute.xlu0 %140 }
 0x199   :  { %v145_v29 = vmul.f32 %v221_v27, %v141_v28  ;;  %v156_v30 = vsel %vm155_vm2, %v153_v26, 0.0 }
 0x19a   :  { %157 = vadd.xlane.f32.xlu1 %v156_v30 }
 0x19b   :  { %v154_v31 = vmul.f32 %v186_v24, %v145_v29 }
 0x19d   :  { %v159_v32 = vsel %vm155_vm2, %v154_v31, 0.0 }
 0x19e   :  { %160 = vadd.xlane.f32.xlu1 %v159_v32 }
 0x227   :  { %v158_v34 = vpop.xlane.xlu1 %157 }
 0x228   :  { %v169_v35 = vadd.f32 %v187_v33, %v158_v34 }
 0x22a   :  { %172 = vst.msk [vmem:[%s353_s5] sm:$0xff] %vm171_vm3, %v169_v35 }
 0x22b   :  { %v161_v36 = vpop.xlane.xlu1 %160 }
 0x22c   :  { %v170_v37 = vadd.f32 %v187_v33, %v161_v36 }
 0x22e   :  { %173 = vst.msk [vmem:[%s353_s5 + $0x8] sm:$0xff] %vm171_vm3, %v170_v37 }
 0x22f   :  { %178 = vsyncpa [#allocation4], 1 }
 0x230   :  { %179 = vsyncpa [#allocation6], 1 }

</bundles_post_ra>
